<compile_context>
chip_gen: v7x
topology: tpu7x:2x2x1
jax: 0.10.0
libtpu: 0.0.40
codegen_flags: <defaults>
</compile_context>

<pallas_src>
import jax
import jax.numpy as jnp
from jax.experimental import pallas as pl
from jax.experimental.pallas import tpu as pltpu

H1 = 256          # 200 padded to a lane multiple
H2 = 256          # 200 padded
H3 = 128          # 100 padded
OUT_LANES = 128   # lane-dense output block width


def mlp2_kernel(x_ref,
                w1_ref, b1_ref,
                w2_ref, b2_ref,
                w3_ref, b3_ref,
                w4_ref, b4_ref,
                o_ref):
    # Layer 1: Linear(input_dim, 200) + ReLU   (Dropout(0.5) -> identity in eval)
    h = jnp.dot(x_ref[...], w1_ref[...],
                preferred_element_type=jnp.float32) + b1_ref[...]
    h = jnp.maximum(h, 0.0)
    # Layer 2: Linear(200, 200) + ReLU         (Dropout(0.2) -> identity in eval)
    h = jnp.dot(h.astype(jnp.bfloat16), w2_ref[...],
                preferred_element_type=jnp.float32) + b2_ref[...]
    h = jnp.maximum(h, 0.0)
    # Layer 3: Linear(200, 100) + ReLU         (Dropout(0.2) -> identity in eval)
    h = jnp.dot(h.astype(jnp.bfloat16), w3_ref[...],
                preferred_element_type=jnp.float32) + b3_ref[...]
    h = jnp.maximum(h, 0.0)
    # Layer 4: Linear(100, 1) as multiply + lane-reduce (VPU/XLU; MXU left free)
    r = jnp.sum(h * w4_ref[...], axis=-1, keepdims=True) + b4_ref[0, 0]
    # Lane-dense store; only column 0 is consumed by the wrapper.
    o_ref[...] = jnp.broadcast_to(r, o_ref.shape)


def _round_up(n, m):
    return ((n + m - 1) // m) * m


def _pad_to(a, shape):
    return jnp.pad(a, [(0, s - d) for d, s in zip(a.shape, shape)])


def prepare_params(params):
    """Zero-pad hidden widths to lane multiples and cast matmul weights to bf16."""
    (w1, b1), (w2, b2), (w3, b3), (w4, b4) = params
    in_dim = w1.shape[0]
    w1p = _pad_to(w1, (in_dim, H1)).astype(jnp.bfloat16)
    b1p = _pad_to(b1, (1, H1)).astype(jnp.float32)      # padded bias entries are 0
    w2p = _pad_to(w2, (H1, H2)).astype(jnp.bfloat16)
    b2p = _pad_to(b2, (1, H2)).astype(jnp.float32)
    w3p = _pad_to(w3, (H2, H3)).astype(jnp.bfloat16)
    b3p = _pad_to(b3, (1, H3)).astype(jnp.float32)
    # Final layer: keep f32, used on the VPU as a broadcastable row.
    w4p = _pad_to(w4, (H3, 1)).reshape(1, H3).astype(jnp.float32)
    b4p = b4.reshape(1, 1).astype(jnp.float32)
    return (w1p, b1p, w2p, b2p, w3p, b3p, w4p, b4p)


def mlp2_forward(x, params, *, tm=256):
    """x: (B, input_dim) f32.  params: list of (W, b) with W stored as (in, out)."""
    B, input_dim = x.shape
    w1p, b1p, w2p, b2p, w3p, b3p, w4p, b4p = prepare_params(params)

    # Modest batch tile (v7x has only 64 MiB physical VMEM), >= 8 sublanes.
    TM = tm if B >= tm else _round_up(B, 8)
    B_pad = _round_up(B, TM)
    xb = x.astype(jnp.bfloat16)
    if B_pad != B:
        xb = jnp.pad(xb, ((0, B_pad - B), (0, 0)))

    grid = (B_pad // TM,)

    def x_map(i):
        return (i, 0)

    def const_map(i):
        return (0, 0)

    out = pl.pallas_call(
        mlp2_kernel,
        out_shape=jax.ShapeDtypeStruct((B_pad, OUT_LANES), jnp.float32),
        grid=grid,
        in_specs=[
            pl.BlockSpec((TM, input_dim), x_map),         # streamed x tiles
            pl.BlockSpec(w1p.shape, const_map),           # weights/biases resident
            pl.BlockSpec(b1p.shape, const_map),
            pl.BlockSpec(w2p.shape, const_map),
            pl.BlockSpec(b2p.shape, const_map),
            pl.BlockSpec(w3p.shape, const_map),
            pl.BlockSpec(b3p.shape, const_map),
            pl.BlockSpec(w4p.shape, const_map),
            pl.BlockSpec(memory_space=pltpu.MemorySpace.SMEM),  # scalar bias b4
        ],
        out_specs=pl.BlockSpec((TM, OUT_LANES), x_map),
        compiler_params=pltpu.CompilerParams(
            dimension_semantics=("parallel",),
            vmem_limit_bytes=32 * 1024 * 1024,
        ),
    )(xb, w1p, b1p, w2p, b2p, w3p, b3p, w4p, b4p)

    return out[:B, :1]


def init_linear(key, fan_in, fan_out):
    """PyTorch nn.Linear default init: U(-1/sqrt(fan_in), 1/sqrt(fan_in))."""
    kw, kb = jax.random.split(key)
    bound = 1.0 / (fan_in ** 0.5)
    # Store W already transposed to (in, out) for x @ W.
    w = jax.random.uniform(kw, (fan_in, fan_out), jnp.float32, -bound, bound)
    b = jax.random.uniform(kb, (1, fan_out), jnp.float32, -bound, bound)
    return w, b


def reference(x, params, *, bf16=False):
    """Pure-JAX forward of the same math (optionally mimicking bf16 MXU inputs)."""
    (w1, b1), (w2, b2), (w3, b3), (w4, b4) = params
    cast = (lambda a: a.astype(jnp.bfloat16)) if bf16 else (lambda a: a)
    h = x
    for w, b in ((w1, b1), (w2, b2), (w3, b3)):
        h = jnp.dot(cast(h), cast(w), preferred_element_type=jnp.float32) + b
        h = jnp.maximum(h, 0.0)
    return jnp.dot(h, w4, preferred_element_type=jnp.float32) + b4


if __name__ == "__main__":
    input_dim = 32
    batch = 8

    key = jax.random.PRNGKey(0)
    k_x, k1, k2, k3, k4 = jax.random.split(key, 5)

    x = jax.random.normal(k_x, (batch, input_dim), jnp.float32)
    params = [
        init_linear(k1, input_dim, 200),
        init_linear(k2, 200, 200),
        init_linear(k3, 200, 100),
        init_linear(k4, 100, 1),
    ]

    out = mlp2_forward(x, params)
    out = jax.block_until_ready(out)
    assert out.shape == (batch, 1)

    # Tight check vs. a reference using the same bf16 matmul inputs.
    ref_bf16 = reference(x, params, bf16=True)
    assert jnp.allclose(out, ref_bf16, atol=1e-3, rtol=1e-3)
    # Loose sanity check vs. full-f32 math (bf16 weights give ~0.1-1% error).
    ref_f32 = reference(x, params, bf16=False)
    assert jnp.allclose(out, ref_f32, atol=5e-2, rtol=5e-2)

    print("KERNEL_OK")
</pallas_src>

<mosaic_0001>
module attributes {stable_mosaic.version = 11 : i64} {
  func.func @mlp2_kernel(%arg0: i32, %arg1: memref<8x32xbf16, #tpu.memory_space<vmem>>, %arg2: memref<32x256xbf16, #tpu.memory_space<vmem>>, %arg3: memref<1x256xf32, #tpu.memory_space<vmem>>, %arg4: memref<256x256xbf16, #tpu.memory_space<vmem>>, %arg5: memref<1x256xf32, #tpu.memory_space<vmem>>, %arg6: memref<256x128xbf16, #tpu.memory_space<vmem>>, %arg7: memref<1x128xf32, #tpu.memory_space<vmem>>, %arg8: memref<1x128xf32, #tpu.memory_space<vmem>>, %arg9: memref<1x1xf32, #tpu.memory_space<smem>>, %arg10: memref<8x128xf32, #tpu.memory_space<vmem>>) attributes {dimension_semantics = [#tpu.dimension_semantics<parallel>], iteration_bounds = array<i64: 1>, scalar_prefetch = 0 : i64, scratch_operands = 0 : i64, tpu.core_type = #tpu.core_type<tc>, window_params = [{transform_indices = @transform_0, window_bounds = array<i64: 8, 32>}, {pipeline_mode = #tpu.pipeline_mode<synchronous>, transform_indices = @transform_1, window_bounds = array<i64: 32, 256>}, {pipeline_mode = #tpu.pipeline_mode<synchronous>, transform_indices = @transform_2, window_bounds = array<i64: 1, 256>}, {pipeline_mode = #tpu.pipeline_mode<synchronous>, transform_indices = @transform_3, window_bounds = array<i64: 256, 256>}, {pipeline_mode = #tpu.pipeline_mode<synchronous>, transform_indices = @transform_4, window_bounds = array<i64: 1, 256>}, {pipeline_mode = #tpu.pipeline_mode<synchronous>, transform_indices = @transform_5, window_bounds = array<i64: 256, 128>}, {pipeline_mode = #tpu.pipeline_mode<synchronous>, transform_indices = @transform_6, window_bounds = array<i64: 1, 128>}, {pipeline_mode = #tpu.pipeline_mode<synchronous>, transform_indices = @transform_7, window_bounds = array<i64: 1, 128>}, {transform_indices = @transform_8, window_bounds = array<i64: 1, 1>}, {transform_indices = @transform_9, window_bounds = array<i64: 8, 128>}]} {
    %c0 = arith.constant 0 : index
    %c0_0 = arith.constant 0 : index
    %0 = vector.load %arg1[%c0, %c0_0] : memref<8x32xbf16, #tpu.memory_space<vmem>>, vector<8x32xbf16>
    %c0_1 = arith.constant 0 : index
    %c0_2 = arith.constant 0 : index
    %1 = vector.load %arg2[%c0_1, %c0_2] : memref<32x256xbf16, #tpu.memory_space<vmem>>, vector<32x256xbf16>
    %cst = arith.constant dense<0.000000e+00> : vector<8x256xf32>
    %2 = tpu.matmul %0, %1, %cst {dimension_numbers = #tpu.dot_dimension_numbers<[1], [0], [0], [1], [0, 0, 1, 1], [], []>} : vector<8x32xbf16>, vector<32x256xbf16>, vector<8x256xf32> -> vector<8x256xf32>
    %c0_3 = arith.constant 0 : index
    %c0_4 = arith.constant 0 : index
    %3 = vector.load %arg3[%c0_3, %c0_4] : memref<1x256xf32, #tpu.memory_space<vmem>>, vector<1x256xf32>
    %4 = vector.broadcast %3 : vector<1x256xf32> to vector<8x256xf32>
    %5 = arith.addf %2, %4 : vector<8x256xf32>
    %cst_5 = arith.constant 0.000000e+00 : f32
    %6 = vector.broadcast %cst_5 : f32 to vector<8x256xf32>
    %7 = arith.maximumf %5, %6 : vector<8x256xf32>
    %8 = arith.truncf %7 : vector<8x256xf32> to vector<8x256xbf16>
    %c0_6 = arith.constant 0 : index
    %c0_7 = arith.constant 0 : index
    %9 = vector.load %arg4[%c0_6, %c0_7] : memref<256x256xbf16, #tpu.memory_space<vmem>>, vector<256x256xbf16>
    %cst_8 = arith.constant dense<0.000000e+00> : vector<8x256xf32>
    %10 = tpu.matmul %8, %9, %cst_8 {dimension_numbers = #tpu.dot_dimension_numbers<[1], [0], [0], [1], [0, 0, 1, 1], [], []>} : vector<8x256xbf16>, vector<256x256xbf16>, vector<8x256xf32> -> vector<8x256xf32>
    %c0_9 = arith.constant 0 : index
    %c0_10 = arith.constant 0 : index
    %11 = vector.load %arg5[%c0_9, %c0_10] : memref<1x256xf32, #tpu.memory_space<vmem>>, vector<1x256xf32>
    %12 = vector.broadcast %11 : vector<1x256xf32> to vector<8x256xf32>
    %13 = arith.addf %10, %12 : vector<8x256xf32>
    %cst_11 = arith.constant 0.000000e+00 : f32
    %14 = vector.broadcast %cst_11 : f32 to vector<8x256xf32>
    %15 = arith.maximumf %13, %14 : vector<8x256xf32>
    %16 = arith.truncf %15 : vector<8x256xf32> to vector<8x256xbf16>
    %c0_12 = arith.constant 0 : index
    %c0_13 = arith.constant 0 : index
    %17 = vector.load %arg6[%c0_12, %c0_13] : memref<256x128xbf16, #tpu.memory_space<vmem>>, vector<256x128xbf16>
    %cst_14 = arith.constant dense<0.000000e+00> : vector<8x128xf32>
    %18 = tpu.matmul %16, %17, %cst_14 {dimension_numbers = #tpu.dot_dimension_numbers<[1], [0], [0], [1], [0, 0, 1, 1], [], []>} : vector<8x256xbf16>, vector<256x128xbf16>, vector<8x128xf32> -> vector<8x128xf32>
    %c0_15 = arith.constant 0 : index
    %c0_16 = arith.constant 0 : index
    %19 = vector.load %arg7[%c0_15, %c0_16] : memref<1x128xf32, #tpu.memory_space<vmem>>, vector<1x128xf32>
    %20 = vector.broadcast %19 : vector<1x128xf32> to vector<8x128xf32>
    %21 = arith.addf %18, %20 : vector<8x128xf32>
    %cst_17 = arith.constant 0.000000e+00 : f32
    %22 = vector.broadcast %cst_17 : f32 to vector<8x128xf32>
    %23 = arith.maximumf %21, %22 : vector<8x128xf32>
    %c0_18 = arith.constant 0 : index
    %c0_19 = arith.constant 0 : index
    %24 = vector.load %arg8[%c0_18, %c0_19] : memref<1x128xf32, #tpu.memory_space<vmem>>, vector<1x128xf32>
    %25 = vector.broadcast %24 : vector<1x128xf32> to vector<8x128xf32>
    %26 = arith.mulf %23, %25 : vector<8x128xf32>
    %cst_20 = arith.constant dense<0.000000e+00> : vector<8xf32>
    %27 = vector.multi_reduction <add>, %26, %cst_20 [1] : vector<8x128xf32> to vector<8xf32>
    %28 = vector.shape_cast %27 : vector<8xf32> to vector<8x1xf32>
    %c0_21 = arith.constant 0 : index
    %c0_22 = arith.constant 0 : index
    %29 = memref.load %arg9[%c0_21, %c0_22] : memref<1x1xf32, #tpu.memory_space<smem>>
    %30 = vector.broadcast %29 : f32 to vector<8x1xf32>
    %31 = arith.addf %28, %30 : vector<8x1xf32>
    %32 = vector.shape_cast %31 : vector<8x1xf32> to vector<8x1xf32>
    %33 = vector.broadcast %32 : vector<8x1xf32> to vector<8x128xf32>
    %c0_23 = arith.constant 0 : index
    %c0_24 = arith.constant 0 : index
    %34 = vector.load %arg10[%c0_23, %c0_24] : memref<8x128xf32, #tpu.memory_space<vmem>>, vector<8x128xf32>
    tpu.vector_store %arg10[%c0_23, %c0_24], %33 {strides = array<i32>} : memref<8x128xf32, #tpu.memory_space<vmem>>, vector<8x128xf32>,
    return
  }
  func.func @transform_0(%arg0: i32) -> (i32, i32) {
    %c0_i32 = arith.constant 0 : i32
    %c0_i32_0 = arith.constant 0 : i32
    return %arg0, %c0_i32 : i32, i32
  }
  func.func @transform_1(%arg0: i32) -> (i32, i32) {
    %c0_i32 = arith.constant 0 : i32
    %c0_i32_0 = arith.constant 0 : i32
    %c0_i32_1 = arith.constant 0 : i32
    return %c0_i32, %c0_i32_0 : i32, i32
  }
  func.func @transform_2(%arg0: i32) -> (i32, i32) {
    %c0_i32 = arith.constant 0 : i32
    %c0_i32_0 = arith.constant 0 : i32
    %c0_i32_1 = arith.constant 0 : i32
    return %c0_i32, %c0_i32_0 : i32, i32
  }
  func.func @transform_3(%arg0: i32) -> (i32, i32) {
    %c0_i32 = arith.constant 0 : i32
    %c0_i32_0 = arith.constant 0 : i32
    %c0_i32_1 = arith.constant 0 : i32
    return %c0_i32, %c0_i32_0 : i32, i32
  }
  func.func @transform_4(%arg0: i32) -> (i32, i32) {
    %c0_i32 = arith.constant 0 : i32
    %c0_i32_0 = arith.constant 0 : i32
    %c0_i32_1 = arith.constant 0 : i32
    return %c0_i32, %c0_i32_0 : i32, i32
  }
  func.func @transform_5(%arg0: i32) -> (i32, i32) {
    %c0_i32 = arith.constant 0 : i32
    %c0_i32_0 = arith.constant 0 : i32
    %c0_i32_1 = arith.constant 0 : i32
    return %c0_i32, %c0_i32_0 : i32, i32
  }
  func.func @transform_6(%arg0: i32) -> (i32, i32) {
    %c0_i32 = arith.constant 0 : i32
    %c0_i32_0 = arith.constant 0 : i32
    %c0_i32_1 = arith.constant 0 : i32
    return %c0_i32, %c0_i32_0 : i32, i32
  }
  func.func @transform_7(%arg0: i32) -> (i32, i32) {
    %c0_i32 = arith.constant 0 : i32
    %c0_i32_0 = arith.constant 0 : i32
    %c0_i32_1 = arith.constant 0 : i32
    return %c0_i32, %c0_i32_0 : i32, i32
  }
  func.func @transform_8(%arg0: i32) -> (i32, i32) {
    %c0_i32 = arith.constant 0 : i32
    %c0_i32_0 = arith.constant 0 : i32
    %c0_i32_1 = arith.constant 0 : i32
    return %c0_i32, %c0_i32_0 : i32, i32
  }
  func.func @transform_9(%arg0: i32) -> (i32, i32) {
    %c0_i32 = arith.constant 0 : i32
    %c0_i32_0 = arith.constant 0 : i32
    return %arg0, %c0_i32 : i32, i32
  }
}

</mosaic_0001>

<bundles_post_ra>
// kernel: tpu_custom_call.1
= control target key start
LH: loop header
LB: loop body
LE: loop exit
PB: predicated region body
PF: predicated region fallthrough
CT: control target
= control target key end

     0   :  { %15 = vsyncpa [#allocation4], 0  ;;  %s1046_s0 = inlined_call_operand.hbm [shape: bf16[8,32], index: 0, kind: input, shape index: {}]   ;;  %s1047_s1 = inlined_call_operand.hbm [shape: bf16[32,256], index: 1, kind: input, shape index: {}]   ;;  %s1048_s2 = inlined_call_operand.vmem [shape: f32[1,256], index: 2, kind: input, shape index: {}]   ;;  %s1049_s3 = inlined_call_operand.hbm [shape: bf16[256,256], index: 3, kind: input, shape index: {}]   ;;  %s1050_s4 = inlined_call_operand.vmem [shape: f32[1,256], index: 4, kind: input, shape index: {}]   ;;  %s1051_s5 = inlined_call_operand.hbm [shape: bf16[256,128], index: 5, kind: input, shape index: {}]   ;;  %s1052_s6 = inlined_call_operand.vmem [shape: f32[1,128], index: 6, kind: input, shape index: {}]   ;;  %s1053_s7 = inlined_call_operand.vmem [shape: f32[1,128], index: 7, kind: input, shape index: {}]   ;;  %s1054_s8 = inlined_call_operand.<no memory space> [shape: f32[1,1], index: 8, kind: input, shape index: {}]   ;;  %s1055_s9 = inlined_call_operand.hbm [shape: f32[8,128], index: 9, kind: output, shape index: {}]  }
   0x1   :  { %16 = vsyncpa [#allocation7], 0 }
   0x2   :  { %17 = vsyncpa [#allocation10], 0 }
   0x3   :  { %18 = vsyncpa [#allocation5], 0  ;;  %s905_s30 = smov [#allocation6]   ;;  %s787_s13 = scalar_lea.hbm %s1047_s1, 512 }
   0x4   :  { %s34_s10 = sshll.u32 %s905_s30, 4  ;;  %p788_p0 = scmp.ne.s32.totalorder %s1047_s1, %s787_s13  ;;  %s35_s10 = int_to_ptr.vmem [resolvable:$true] %s34_s10 }
   0x5   :  { %p791_p1 = scmp.lt.u32.totalorder %s787_s13, %s1047_s1 }
   0x7   :  { %p793_p2 = pnand %p791_p1, %p788_p0 }
   0x9   :  { %796 = shalt.err (!%p793_p2)
}
   0xa   :  { %s797_s18 = scalar_lea.vmem %s35_s10, 512  ;;  %p802_p4 = scmp.lt.s32.totalorder %s35_s10, %s35_s10 }
   0xb   :  { %p798_p3 = scmp.ne.s32.totalorder %s35_s10, %s797_s18  ;;  %p803_p5 = scmp.lt.s32.totalorder %s797_s18, %s797_s18 }
   0xd   :  { %p804_p6 = por %p803_p5, %p802_p4 }
   0xf   :  { %p805_p7 = pnand %p804_p6, %p798_p3 }
  0x11   :  { %808 = shalt.err (!%p805_p7)
}
  0x12   :  { %s906_s19 = smov 128   ;;  %s907_s20 = smov 8  }
  0x13   :  { %40 = dma.hbm_to_vmem [thread:$0]  %s1047_s1, 512, %s35_s10, [#allocation7], %s906_s19, %s906_s19, %s907_s20  }
  0x14   :  { %s908_s23 = smov [#allocation3]   ;;  %s909_s25 = smov [#allocation8]  }
  0x15   :  { %s25_s24 = sshll.u32 %s908_s23, 4  ;;  %s48_s26 = sshll.u32 %s909_s25, 4  ;;  %s26_s24 = int_to_ptr.vmem [resolvable:$true] %s25_s24  ;;  %s49_s26 = int_to_ptr.vmem [resolvable:$true] %s48_s26 }
  0x16   :  { %s809_s29 = scalar_lea.hbm %s1046_s0, 64 }
  0x17   :  { %p810_p8 = scmp.ne.s32.totalorder %s1046_s0, %s809_s29  ;;  %p813_p9 = scmp.lt.u32.totalorder %s809_s29, %s1046_s0 }
  0x19   :  { %p815_p10 = pnand %p813_p9, %p810_p8 }
  0x1b   :  { %818 = shalt.err (!%p815_p10)
}
  0x1c   :  { %s819_s1 = scalar_lea.vmem %s26_s24, 64  ;;  %p824_p12 = scmp.lt.s32.totalorder %s26_s24, %s26_s24 }
  0x1d   :  { %p820_p11 = scmp.ne.s32.totalorder %s26_s24, %s819_s1  ;;  %p825_p13 = scmp.lt.s32.totalorder %s819_s1, %s819_s1 }
  0x1f   :  { %p826_p0 = por %p825_p13, %p824_p12 }
  0x21   :  { %p827_p1 = pnand %p826_p0, %p820_p11 }
  0x23   :  { %830 = shalt.err (!%p827_p1)
}
  0x24   :  { %28 = dma.hbm_to_vmem [thread:$0]  %s1046_s0, 64, %s26_s24, [#allocation4]  }
  0x25   :  { %s831_s17 = scalar_lea.hbm %s1049_s3, 4096 }
  0x26   :  { %p832_p2 = scmp.ne.s32.totalorder %s1049_s3, %s831_s17  ;;  %p835_p3 = scmp.lt.u32.totalorder %s831_s17, %s1049_s3 }
  0x28   :  { %p837_p4 = pnand %p835_p3, %p832_p2 }
  0x2a   :  { %840 = shalt.err (!%p837_p4)
}
  0x2b   :  { %s841_s25 = scalar_lea.vmem %s49_s26, 4096  ;;  %p846_p6 = scmp.lt.s32.totalorder %s49_s26, %s49_s26 }
  0x2c   :  { %p842_p5 = scmp.ne.s32.totalorder %s49_s26, %s841_s25  ;;  %p847_p7 = scmp.lt.s32.totalorder %s841_s25, %s841_s25 }
  0x2e   :  { %p848_p8 = por %p847_p7, %p846_p6 }
  0x30   :  { %p849_p9 = pnand %p848_p8, %p842_p5 }
  0x32   :  { %852 = shalt.err (!%p849_p9)
}
  0x33   :  { %54 = dma.hbm_to_vmem [thread:$0]  %s1049_s3, 4096, %s49_s26, [#allocation7], %s906_s19, %s906_s19, %s907_s20  }
  0x34   :  { %s910_s27 = smov [#allocation9]   ;;  %s853_s11 = scalar_lea.hbm %s1051_s5, 2048 }
  0x35   :  { %s62_s28 = sshll.u32 %s910_s27, 4  ;;  %p854_p10 = scmp.ne.s32.totalorder %s1051_s5, %s853_s11  ;;  %s63_s28 = int_to_ptr.vmem [resolvable:$true] %s62_s28 }
  0x36   :  { %p857_p11 = scmp.lt.u32.totalorder %s853_s11, %s1051_s5 }
  0x38   :  { %p859_p12 = pnand %p857_p11, %p854_p10 }
  0x3a   :  { %862 = shalt.err (!%p859_p12)
}
  0x3b   :  { %s863_s14 = scalar_lea.vmem %s63_s28, 2048  ;;  %p868_p0 = scmp.lt.s32.totalorder %s63_s28, %s63_s28 }
  0x3c   :  { %p864_p13 = scmp.ne.s32.totalorder %s63_s28, %s863_s14  ;;  %p869_p1 = scmp.lt.s32.totalorder %s863_s14, %s863_s14 }
  0x3e   :  { %p870_p2 = por %p869_p1, %p868_p0 }
  0x40   :  { %p871_p3 = pnand %p870_p2, %p864_p13 }
  0x42   :  { %874 = shalt.err (!%p871_p3)
}
  0x43   :  { %s911_s3 = smov 64   ;;  %s912_s19 = smov 4  }
  0x44   :  { %68 = dma.hbm_to_vmem [thread:$0]  %s1051_s5, 2048, %s63_s28, [#allocation10], %s911_s3, %s911_s3, %s912_s19  }
  0x45   :  { %897 = dma.done.wait [#allocation4], 64  }
  0x46   :  { %898 = vsyncadd [#allocation4], 4294967232 }
  0x47   :  { %899 = dma.done.wait [#allocation7], 4608  }
  0x48   :  { %900 = vsyncadd [#allocation7], 4294962688 }
  0x49   :  { %901 = dma.done.wait [#allocation10], 2048  }
  0x4a   :  { %902 = vsyncadd [#allocation10], 4294965248  ;;  %v913_v0 = vmov 0   ;;  %v717_v1 = vld [vmem:[#allocation6 + $0x4] ss:$8 sps:$4 sm:$0xff]   ;;  %vm125_vm0 = vcmask 261120   ;;  %v95_v50 = vlaneseq }
  0x4b   :  { %161 = vmatprep.mubr.bf16.mxu0 %v913_v0  ;;  %v719_v2 = vld [vmem:[#allocation6] ss:$8 sps:$4 sm:$0xff]   ;;  %129 = vmatprep.subr.bf16.mxu0 %v717_v1  ;;  %v720_v3 = vld [vmem:[#allocation6 + $0x14] ss:$8 sps:$4 sm:$0xff]   ;;  %v722_v4 = vld [vmem:[#allocation6 + $0x10] ss:$8 sps:$4 sm:$0xff]  }
  0x4c   :  { %130 = vmatpush1.bf16.msra.mxu0 %v719_v2  ;;  %v723_v5 = vld [vmem:[#allocation8 + $0x4] ss:$8 sps:$4 sm:$0xff]   ;;  %v725_v6 = vld [vmem:[#allocation8] ss:$8 sps:$4 sm:$0xff]   ;;  %v726_v7 = vld [vmem:[#allocation8 + $0x14] ss:$8 sps:$4 sm:$0xff]  }
  0x4d   :  { %131 = vmatprep.subr.bf16.mxu0 %v720_v3  ;;  %378 = vmatprep.subr.bf16.mxu1 %v723_v5  ;;  %v88_v8 = vld [vmem:[#allocation3] sm:$0xf]  ;;  %v728_v9 = vld [vmem:[#allocation8 + $0x10] ss:$8 sps:$4 sm:$0xff]   ;;  %v729_v10 = vld [vmem:[#allocation8 + $0x24] ss:$8 sps:$4 sm:$0xff]  }
  0x4e   :  { %379 = vmatpush1.bf16.msra.mxu1 %v725_v6  ;;  %v731_v11 = vld [vmem:[#allocation8 + $0x20] ss:$8 sps:$4 sm:$0xff]   ;;  %v732_v12 = vld [vmem:[#allocation8 + $0x34] ss:$8 sps:$4 sm:$0xff]   ;;  %v734_v13 = vld [vmem:[#allocation8 + $0x30] ss:$8 sps:$4 sm:$0xff]  }
  0x4f   :  { %380 = vmatprep.subr.bf16.mxu1 %v726_v7  ;;  %v735_v14 = vld [vmem:[#allocation8 + $0x44] ss:$8 sps:$4 sm:$0xff]   ;;  %v737_v15 = vld [vmem:[#allocation8 + $0x40] ss:$8 sps:$4 sm:$0xff]   ;;  %v738_v16 = vld [vmem:[#allocation8 + $0x54] ss:$8 sps:$4 sm:$0xff]  }
  0x50   :  { %132 = vmatpush1.bf16.msra.mxu0 %v722_v4  ;;  %v740_v17 = vld [vmem:[#allocation8 + $0x50] ss:$8 sps:$4 sm:$0xff]   ;;  %v741_v18 = vld [vmem:[#allocation8 + $0x64] ss:$8 sps:$4 sm:$0xff]   ;;  %v743_v19 = vld [vmem:[#allocation8 + $0x60] ss:$8 sps:$4 sm:$0xff]  }
  0x51   :  { %v744_v20 = vld [vmem:[#allocation8 + $0x74] ss:$8 sps:$4 sm:$0xff]   ;;  %v746_v21 = vld [vmem:[#allocation8 + $0x70] ss:$8 sps:$4 sm:$0xff]   ;;  %v747_v22 = vld [vmem:[#allocation8 + $0x84] ss:$8 sps:$4 sm:$0xff]  }
  0x52   :  { %381 = vmatpush1.bf16.msra.mxu1 %v728_v9  ;;  %v749_v23 = vld [vmem:[#allocation8 + $0x80] ss:$8 sps:$4 sm:$0xff]   ;;  %v750_v24 = vld [vmem:[#allocation8 + $0x94] ss:$8 sps:$4 sm:$0xff]   ;;  %v752_v25 = vld [vmem:[#allocation8 + $0x90] ss:$8 sps:$4 sm:$0xff]  }
  0x53   :  { %634 = vmatmul.mubr.msk.bf16.vlgmr.msra.gmra.mrb[0].mxu0 %vm125_vm0, %v88_v8  ;;  %382 = vmatprep.subr.bf16.mxu1 %v729_v10  ;;  %v753_v26 = vld [vmem:[#allocation8 + $0xa4] ss:$8 sps:$4 sm:$0xff]   ;;  %v755_v27 = vld [vmem:[#allocation8 + $0xa0] ss:$8 sps:$4 sm:$0xff]   ;;  %v756_v28 = vld [vmem:[#allocation8 + $0xb4] ss:$8 sps:$4 sm:$0xff]  }
  0x54   :  { %v758_v29 = vld [vmem:[#allocation8 + $0xb0] ss:$8 sps:$4 sm:$0xff]   ;;  %v759_v30 = vld [vmem:[#allocation8 + $0xc4] ss:$8 sps:$4 sm:$0xff]   ;;  %v761_v31 = vld [vmem:[#allocation8 + $0xc0] ss:$8 sps:$4 sm:$0xff]  }
  0x55   :  { %v762_v32 = vld [vmem:[#allocation8 + $0xd4] ss:$8 sps:$4 sm:$0xff]   ;;  %v764_v33 = vld [vmem:[#allocation8 + $0xd0] ss:$8 sps:$4 sm:$0xff]   ;;  %v765_v34 = vld [vmem:[#allocation8 + $0xe4] ss:$8 sps:$4 sm:$0xff]  }
  0x56   :  { %383 = vmatpush1.bf16.msra.mxu1 %v731_v11  ;;  %v767_v35 = vld [vmem:[#allocation8 + $0xe0] ss:$8 sps:$4 sm:$0xff]   ;;  %v768_v36 = vld [vmem:[#allocation8 + $0xf4] ss:$8 sps:$4 sm:$0xff]   ;;  %v770_v37 = vld [vmem:[#allocation8 + $0xf0] ss:$8 sps:$4 sm:$0xff]  }
  0x57   :  { %384 = vmatprep.subr.bf16.mxu1 %v732_v12  ;;  %v771_v38 = vld [vmem:[#allocation9 + $0x40] sm:$0xff]   ;;  %v773_v40 = vld [vmem:[#allocation9 + $0x48] sm:$0xff]   ;;  %v775_v42 = vld [vmem:[#allocation9 + $0x50] sm:$0xff]   ;;  %v96_v51 = vshrl.u32 %v95_v50, 7  ;;  %s914_s25 = smov [#allocation11]  }
  0x58   :  { %v772_v39 = vld [vmem:[#allocation9] sm:$0xff]   ;;  %685 = vmatprep.subr.bf16.mxu0 %v771_v38  ;;  %v774_v41 = vld [vmem:[#allocation9 + $0x8] sm:$0xff]   ;;  %v776_v43 = vld [vmem:[#allocation9 + $0x10] sm:$0xff]   ;;  %s619_s0 = sshll.u32 %s914_s25, 4  ;;  %s620_s0 = int_to_ptr.vmem [resolvable:$true] %s619_s0 }
  0x59   :  { %686 = vmatpush3.bf16.msra.mxu0 %v772_v39  ;;  %v777_v44 = vld [vmem:[#allocation9 + $0x58] sm:$0xff]   ;;  %v779_v46 = vld [vmem:[#allocation9 + $0x60] sm:$0xff]   ;;  %v781_v48 = vld [vmem:[#allocation9 + $0x68] sm:$0xff]   ;;  %v97_v52 = vsub.s32 0, %v96_v51  ;;  %v101_v54 = vsub.s32 1, %v96_v51  ;;  %p880_p5 = scmp.lt.s32.totalorder %s620_s0, %s620_s0 }
  0x5a   :  { %385 = vmatpush1.bf16.msra.mxu1 %v734_v13  ;;  %687 = vmatprep.subr.bf16.mxu0 %v773_v40  ;;  %v778_v45 = vld [vmem:[#allocation9 + $0x18] sm:$0xff]   ;;  %v780_v47 = vld [vmem:[#allocation9 + $0x20] sm:$0xff]   ;;  %v782_v49 = vld [vmem:[#allocation9 + $0x28] sm:$0xff]  }
  0x5b   :  { %386 = vmatprep.subr.bf16.mxu1 %v735_v14  ;;  %v93_v53 = vld [vmem:[%s1048_s2] sm:$0x3]  ;;  %v783_v3 = vld [vmem:[#allocation9 + $0x70] sm:$0xff]  }
  0x5c   :  { %v98_v55 = vrot.slane %v93_v53, %v97_v52  ;;  %v102_v56 = vrot.slane %v93_v53, %v101_v54  ;;  %v784_v4 = vld [vmem:[#allocation9 + $0x30] sm:$0xff]   ;;  %v785_v5 = vld [vmem:[#allocation9 + $0x78] sm:$0xff]  }
  0x5d   :  { %688 = vmatpush3.bf16.msra.mxu0 %v774_v41  ;;  %v786_v6 = vld [vmem:[#allocation9 + $0x38] sm:$0xff]  }
  0x5e   :  { %387 = vmatpush1.bf16.msra.mxu1 %v737_v15  ;;  %689 = vmatprep.subr.bf16.mxu0 %v775_v42  ;;  %v206_v7 = vld [vmem:[%s1050_s4] sm:$0x3] }
  0x5f   :  { %388 = vmatprep.subr.bf16.mxu1 %v738_v16  ;;  %v211_v8 = vrot.slane %v206_v7, %v97_v52  ;;  %v215_v9 = vrot.slane %v206_v7, %v101_v54 }
  0x61   :  { %690 = vmatpush3.bf16.msra.mxu0 %v776_v43 }
  0x62   :  { %389 = vmatpush1.bf16.msra.mxu1 %v740_v17  ;;  %691 = vmatprep.subr.bf16.mxu0 %v777_v44 }
  0x63   :  { %390 = vmatprep.subr.bf16.mxu1 %v741_v18 }
  0x65   :  { %692 = vmatpush3.bf16.msra.mxu0 %v778_v45 }
  0x66   :  { %391 = vmatpush1.bf16.msra.mxu1 %v743_v19  ;;  %693 = vmatprep.subr.bf16.mxu0 %v779_v46 }
  0x67   :  { %392 = vmatprep.subr.bf16.mxu1 %v744_v20 }
  0x69   :  { %694 = vmatpush3.bf16.msra.mxu0 %v780_v47 }
  0x6a   :  { %393 = vmatpush1.bf16.msra.mxu1 %v746_v21  ;;  %695 = vmatprep.subr.bf16.mxu0 %v781_v48 }
  0x6b   :  { %394 = vmatprep.subr.bf16.mxu1 %v747_v22  ;;  %v667_v22 = vld [vmem:[%s1052_s6] ss:$0 sm:$0xff]  ;;  %s875_s6 = scalar_lea.vmem %s620_s0, 128 }
  0x6c   :  { %p876_p4 = scmp.ne.s32.totalorder %s620_s0, %s875_s6  ;;  %p881_p6 = scmp.lt.s32.totalorder %s875_s6, %s875_s6 }
  0x6d   :  { %696 = vmatpush3.bf16.msra.mxu0 %v782_v49 }
  0x6e   :  { %395 = vmatpush1.bf16.msra.mxu1 %v749_v23  ;;  %697 = vmatprep.subr.bf16.mxu0 %v783_v3  ;;  %p882_p7 = por %p881_p6, %p880_p5 }
  0x6f   :  { %396 = vmatprep.subr.bf16.mxu1 %v750_v24 }
  0x70   :  { %p883_p8 = pnand %p882_p7, %p876_p4 }
  0x71   :  { %698 = vmatpush3.bf16.msra.mxu0 %v784_v4 }
  0x72   :  { %397 = vmatpush1.bf16.msra.mxu1 %v752_v25  ;;  %699 = vmatprep.subr.bf16.mxu0 %v785_v5 }
  0x73   :  { %398 = vmatprep.subr.bf16.mxu1 %v753_v26 }
  0x75   :  { %700 = vmatpush3.bf16.msra.mxu0 %v786_v6 }
  0x76   :  { %399 = vmatpush1.bf16.msra.mxu1 %v755_v27  ;;  %v684_v27 = vld [vmem:[%s1053_s7] ss:$0 sm:$0xff] }
  0x77   :  { %400 = vmatprep.subr.bf16.mxu1 %v756_v28 }
  0x7a   :  { %401 = vmatpush1.bf16.msra.mxu1 %v758_v29 }
  0x7b   :  { %402 = vmatprep.subr.bf16.mxu1 %v759_v30  ;;  %v610_v30 = vstv %s1054_s8 }
  0x7e   :  { %403 = vmatpush1.bf16.msra.mxu1 %v761_v31 }
  0x7f   :  { %404 = vmatprep.subr.bf16.mxu1 %v762_v32 }
  0x82   :  { %405 = vmatpush1.bf16.msra.mxu1 %v764_v33 }
  0x83   :  { %406 = vmatprep.subr.bf16.mxu1 %v765_v34 }
  0x86   :  { %407 = vmatpush1.bf16.msra.mxu1 %v767_v35 }
  0x87   :  { %408 = vmatprep.subr.bf16.mxu1 %v768_v36 }
  0x8a   :  { %409 = vmatpush1.bf16.msra.mxu1 %v770_v37 }
 0x126   :  { %v163_v57 = vpop.f32.mrb[0].mxu0 }
 0x127   :  { %v164_v58 = vadd.f32 %v163_v57, %v98_v55  ;;  %v165_v59 = vpop.f32.mrb[1].mxu0 }
 0x128   :  { %v166_v60 = vadd.f32 %v165_v59, %v102_v56  ;;  %v167_v61 = vpop.f32.mrb[2].mxu0 }
 0x129   :  { %v170_v62 = vmax.f32 %v164_v58, 0.0  ;;  %v168_v63 = vpop.f32.mrb[3].mxu0 }
 0x12a   :  { %v171_v0 = vmax.f32 %v166_v60, 0.0 }
 0x12b   :  { %v172_v2 = vpack.c.bf16 %v170_v62, %v170_v62 }
 0x12c   :  { %v173_v1 = vpack.c.bf16 %v171_v0, %v171_v0 }
 0x12e   :  { %410 = vmatprep.mubr.bf16.mxu1 %v173_v1 }
 0x12f   :  { %411 = vmatmul.mubr.bf16.vlgmr.msra.gmra.mrb[0].mxu1 %v172_v2 }
 0x202   :  { %v412_v10 = vpop.f32.mrb[0].mxu1 }
 0x203   :  { %v413_v11 = vadd.f32 %v412_v10, %v211_v8  ;;  %v414_v12 = vpop.f32.mrb[1].mxu1 }
 0x204   :  { %v415_v13 = vadd.f32 %v414_v12, %v215_v9  ;;  %v416_v14 = vpop.f32.mrb[2].mxu1 }
 0x205   :  { %v419_v15 = vmax.f32 %v413_v11, 0.0  ;;  %v417_v16 = vpop.f32.mrb[3].mxu1 }
 0x206   :  { %v420_v17 = vmax.f32 %v415_v13, 0.0 }
 0x207   :  { %v421_v19 = vpack.c.bf16 %v419_v15, %v419_v15 }
 0x208   :  { %v422_v18 = vpack.c.bf16 %v420_v17, %v420_v17 }
 0x20a   :  { %590 = vmatprep.mubr.bf16.mxu0 %v422_v18 }
 0x20b   :  { %591 = vmatmul.mubr.bf16.vlgmr.msra.gmra.mrb[4].mxu0 %v421_v19 }
 0x2de   :  { %v701_v20 = vpop.f32.mrb[4].mxu0 }
 0x2df   :  { %v702_v21 = vpop.f32.mrb[5].mxu0 }
 0x2e0   :  { %v703_v23 = vadd.f32 %v702_v21, %v701_v20  ;;  %v704_v24 = vpop.f32.mrb[6].mxu0 }
 0x2e1   :  { %v705_v25 = vpop.f32.mrb[7].mxu0 }
 0x2e2   :  { %v593_v26 = vadd.f32 %v703_v23, %v667_v22 }
 0x2e4   :  { %v598_v28 = vmax.f32 %v593_v26, 0.0 }
 0x2e6   :  { %v606_v29 = vmul.f32 %v684_v27, %v598_v28 }
 0x2e8   :  { %607 = vadd.xlane.f32.xlu0 %v606_v29 }
 0x375   :  { %v608_v31 = vpop.xlane.xlu0 %607 }
 0x376   :  { %v611_v32 = vadd.f32 %v610_v30, %v608_v31 }
 0x378   :  { %612 = vst [vmem:[#allocation11] sm:$0xff] %v611_v32 }
 0x379   :  { %886 = shalt.err (!%p883_p8)
}
 0x37a   :  { %s887_s27 = scalar_lea.hbm %s1055_s9, 128 }
 0x37b   :  { %p888_p9 = scmp.ne.s32.totalorder %s1055_s9, %s887_s27  ;;  %p891_p10 = scmp.lt.u32.totalorder %s887_s27, %s1055_s9 }
 0x37d   :  { %p893_p11 = pnand %p891_p10, %p888_p9 }
 0x37f   :  { %896 = shalt.err (!%p893_p11)
}
 0x380   :  { %622 = dma.vmem_to_hbm [thread:$0]  %s620_s0, 128, %s1055_s9, [#allocation5]  }
 0x381   :  { %903 = dma.done.wait [#allocation5], 128  }
 0x382   :  { %904 = vsyncadd [#allocation5], 4294967168 }
 0x383   :  { %626 = vsyncpa [#allocation4], 1 }
 0x384   :  { %627 = vsyncpa [#allocation7], 1 }
 0x385   :  { %628 = vsyncpa [#allocation10], 1 }
 0x386   :  { %629 = vsyncpa [#allocation5], 1 }

</bundles_post_ra>
